<compile_context>
chip_gen: v6e
topology: v6e:2x2x1
jax: 0.10.0
libtpu: 0.0.40
codegen_flags: <defaults>
</compile_context>

<pallas_src>
import math

import numpy as np
import jax
import jax.numpy as jnp
from jax.experimental import pallas as pl
from jax.experimental.pallas import tpu as pltpu


# ----------------------------------------------------------------------------
# Deterministic host-side "parameter" construction (plays the role of __init__ / RNG draws)
# ----------------------------------------------------------------------------
def gaussian_1d(ksize: int, sigma: float) -> np.ndarray:
    """Normalized 1-D Gaussian; outer(g, g) equals the isotropic 2-D kernel of the reference."""
    ax = np.arange(ksize, dtype=np.float64) - (ksize - 1) / 2.0
    g = np.exp(-(ax * ax) / (2.0 * sigma * sigma))
    g /= g.sum()
    return g


def reflect101_blur_matrix(n: int, g1: np.ndarray) -> np.ndarray:
    """Row operator applying the 1-D blur with cv2 BORDER_REFLECT_101 boundary handling."""
    k = len(g1)
    p = k // 2
    b = np.zeros((n, n), dtype=np.float64)
    for i in range(n):
        for t in range(k):
            r = i + t - p
            if r < 0:
                r = -r
            elif r > n - 1:
                r = 2 * (n - 1) - r
            b[i, r] += g1[t]
    return b


def bilinear_matrix(n_out: int, n_in: int) -> np.ndarray:
    """Row-interpolation matrix reproducing cv2.INTER_LINEAR (half-pixel centers)."""
    m = np.zeros((n_out, n_in), dtype=np.float64)
    for i in range(n_out):
        src = (i + 0.5) * n_in / n_out - 0.5
        i0 = int(math.floor(src))
        frac = src - i0
        i0c = min(max(i0, 0), n_in - 1)
        i1c = min(max(i0 + 1, 0), n_in - 1)
        m[i, i0c] += 1.0 - frac
        m[i, i1c] += frac
    return m


def _pick_row_tile(h: int) -> int:
    """Largest multiple-of-8 tile (< h) that divides h; fall back to the full height."""
    for th in (256, 128, 64, 32, 16, 8):
        if th < h and h % th == 0:
            return th
    return h


# ----------------------------------------------------------------------------
# Fused Pallas kernel:
#   step 0 : per channel  yw[c] = clip(dhb @ (x[c] @ dwbT) + noise[c], 0, 255) @ uwT  -> VMEM
#   every  : per channel  o[c]  = clip(uh_tile @ yw[c], 0, 1)        (1/255 folded into uh)
# ----------------------------------------------------------------------------
def _fused_kernel(x_ref, dhb_ref, dwbT_ref, noise_ref, uh_ref, uwT_ref, o_ref, yw_ref):
    C = x_ref.shape[0]

    @pl.when(pl.program_id(0) == 0)
    def _():
        for c in range(C):  # static unroll, C == 3
            # blur+downsample along W then H (blur folded into the matrices)
            xw = jnp.dot(x_ref[c], dwbT_ref[...], preferred_element_type=jnp.float32)   # (H, wd)
            yd = jnp.dot(dhb_ref[...], xw, preferred_element_type=jnp.float32)          # (hd, wd)
            # + gaussian noise, clip to [0, 255]
            yd = jnp.clip(yd + noise_ref[c], 0.0, 255.0)
            # TODO(synk): JPEG compression (cv2.imencode/imdecode) has no Pallas equivalent; skipped.
            # width upsample (shared by every output row tile) -> keep VMEM-resident
            yw_ref[c] = jnp.dot(yd, uwT_ref[...], preferred_element_type=jnp.float32)   # (hd, W)

    for c in range(C):
        # height upsample for this output row tile; 1/255 folded into uh, so
        # clip(v, 0, 255)/255 == clip(o, 0, 1)
        o = jnp.dot(uh_ref[...], yw_ref[c], preferred_element_type=jnp.float32)         # (TH, W)
        o_ref[c] = jnp.clip(o, 0.0, 1.0)


def degrade_fused(x, dhb, dwbT, noise_chw, uh, uwT, th):
    C, H, W = x.shape
    hd = dhb.shape[0]
    wd = dwbT.shape[1]
    grid = (H // th,)
    return pl.pallas_call(
        _fused_kernel,
        out_shape=jax.ShapeDtypeStruct((C, H, W), jnp.float32),
        grid=grid,
        in_specs=[
            pl.BlockSpec((C, H, W), lambda i: (0, 0, 0)),      # image: resident across steps
            pl.BlockSpec((hd, H), lambda i: (0, 0)),           # Dh @ Bh
            pl.BlockSpec((W, wd), lambda i: (0, 0)),           # (Dw @ Bw)^T
            pl.BlockSpec((C, hd, wd), lambda i: (0, 0, 0)),    # noise (RGB channel order)
            pl.BlockSpec((th, hd), lambda i: (i, 0)),          # Uh/255 row tile
            pl.BlockSpec((wd, W), lambda i: (0, 0)),           # Uw^T
        ],
        out_specs=pl.BlockSpec((C, th, W), lambda i: (0, i, 0)),
        scratch_shapes=[pltpu.VMEM((C, hd, W), jnp.float32)],  # width-upsampled intermediate
        compiler_params=pltpu.CompilerParams(
            dimension_semantics=("arbitrary",)),  # scratch carries the intermediate across steps
    )(x, dhb, dwbT, noise_chw, uh, uwT)


# ----------------------------------------------------------------------------
# Wrapper reproducing BlindTransform.forward (deterministic variant)
# ----------------------------------------------------------------------------
def blind_transform(img_hwc_rgb, noise_bgr_chw, opt):
    """img_hwc_rgb: (H, W, 3) float32 RGB in [0, 255].
    noise_bgr_chw: (3, hd, wd) float32 noise, BGR channel order (matches the reference which adds
                   noise after RGB->BGR conversion).
    Returns (3, H, W) float32 RGB in [0, 1]."""
    H, W, _ = img_hwc_rgb.shape
    K = opt["blur_kernel_size"]
    sigma = 0.5 * (opt["blur_sigma"][0] + opt["blur_sigma"][1])        # deterministic draw
    scale = 0.5 * (opt["downsample_range"][0] + opt["downsample_range"][1])
    hd = wd = int(W // scale)                                          # cv2 uses (w//scale, w//scale)

    # TODO(synk): random_mixed_kernels samples iso/aniso/generalized kernels at random;
    #             only the (separable) isotropic Gaussian branch is reproduced here.
    g1 = gaussian_1d(K, sigma)
    bh = reflect101_blur_matrix(H, g1)
    bw = reflect101_blur_matrix(W, g1)

    # Fold blur (+ reflect pad) into the downsample matrices; fold 1/255 into the upsample matrix.
    dhb = jnp.asarray((bilinear_matrix(hd, H) @ bh).astype(np.float32))        # (hd, H)
    dwbT = jnp.asarray((bilinear_matrix(wd, W) @ bw).T.astype(np.float32))     # (W, wd)
    uh = jnp.asarray((bilinear_matrix(H, hd) / 255.0).astype(np.float32))      # (H, hd)
    uwT = jnp.asarray(bilinear_matrix(W, wd).T.astype(np.float32))             # (wd, W)

    # The RGB->BGR and BGR->RGB flips of the reference cancel through this channel-symmetric
    # pipeline; only the noise channel order needs flipping (tiny host-side op).
    x = jnp.transpose(img_hwc_rgb, (2, 0, 1)).astype(jnp.float32)              # (3, H, W) RGB
    noise_chw = noise_bgr_chw[::-1].astype(jnp.float32)                        # (3, hd, wd) RGB

    th = _pick_row_tile(H)
    # TODO(synk): probabilistic color_jitter / gray / color_jitter_pt branches are stochastic
    #             no-ops when their probabilities are disabled (as here).
    return degrade_fused(x, dhb, dwbT, noise_chw, uh, uwT, th)                 # (3, H, W) RGB [0,1]


if __name__ == "__main__":
    opt = {
        "blur_kernel_size": 5,
        "blur_sigma": [0.8, 1.6],
        "kernel_list": ["iso"],
        "kernel_prob": [1.0],
        "downsample_range": [1.0, 3.0],     # deterministic mid -> scale = 2.0
        "noise_range": [0.0, 20.0],
        "jpeg_range": [60, 100],
    }

    H, W, C = 16, 16, 3
    key = jax.random.PRNGKey(0)
    k_img, k_noise = jax.random.split(key)

    img = jax.random.uniform(k_img, (H, W, C), jnp.float32, 0.0, 255.0)

    scale = 0.5 * (opt["downsample_range"][0] + opt["downsample_range"][1])
    hd = wd = int(W // scale)
    noise_sigma = 0.5 * (opt["noise_range"][0] + opt["noise_range"][1]) / 255.0
    noise = jax.random.normal(k_noise, (C, hd, wd), jnp.float32) * noise_sigma   # BGR channel order

    out = blind_transform(img, noise, opt)
    out = jax.block_until_ready(out)

    assert out.shape == (C, H, W) and out.dtype == jnp.float32
    assert bool(jnp.all(out >= 0.0)) and bool(jnp.all(out <= 1.0))
    print("KERNEL_OK")
</pallas_src>

<mosaic_0001>
module attributes {stable_mosaic.version = 11 : i64} {
  func.func @_fused_kernel(%arg0: i32, %arg1: memref<3x16x16xf32, #tpu.memory_space<vmem>>, %arg2: memref<8x16xf32, #tpu.memory_space<vmem>>, %arg3: memref<16x8xf32, #tpu.memory_space<vmem>>, %arg4: memref<3x8x8xf32, #tpu.memory_space<vmem>>, %arg5: memref<8x8xf32, #tpu.memory_space<vmem>>, %arg6: memref<8x16xf32, #tpu.memory_space<vmem>>, %arg7: memref<3x8x16xf32, #tpu.memory_space<vmem>>, %arg8: memref<3x8x16xf32, #tpu.memory_space<vmem>>) attributes {dimension_semantics = [#tpu.dimension_semantics<arbitrary>], iteration_bounds = array<i64: 2>, scalar_prefetch = 0 : i64, scratch_operands = 1 : i64, tpu.core_type = #tpu.core_type<tc>, window_params = [{pipeline_mode = #tpu.pipeline_mode<synchronous>, transform_indices = @transform_0, window_bounds = array<i64: 3, 16, 16>}, {pipeline_mode = #tpu.pipeline_mode<synchronous>, transform_indices = @transform_1, window_bounds = array<i64: 8, 16>}, {pipeline_mode = #tpu.pipeline_mode<synchronous>, transform_indices = @transform_2, window_bounds = array<i64: 16, 8>}, {pipeline_mode = #tpu.pipeline_mode<synchronous>, transform_indices = @transform_3, window_bounds = array<i64: 3, 8, 8>}, {transform_indices = @transform_4, window_bounds = array<i64: 8, 8>}, {pipeline_mode = #tpu.pipeline_mode<synchronous>, transform_indices = @transform_5, window_bounds = array<i64: 8, 16>}, {transform_indices = @transform_6, window_bounds = array<i64: 3, 8, 16>}]} {
    %c0_i32 = arith.constant 0 : i32
    %0 = arith.cmpi eq, %arg0, %c0_i32 : i32
    %1 = arith.extui %0 : i1 to i32
    %c0_i32_0 = arith.constant 0 : i32
    %2 = arith.cmpi ne, %1, %c0_i32_0 : i32
    scf.if %2 {
      %c0_30 = arith.constant 0 : index
      %c0_31 = arith.constant 0 : index
      %c0_32 = arith.constant 0 : index
      %36 = vector.load %arg1[%c0_30, %c0_31, %c0_32] : memref<3x16x16xf32, #tpu.memory_space<vmem>>, vector<1x16x16xf32>
      %37 = vector.shape_cast %36 : vector<1x16x16xf32> to vector<16x16xf32>
      %c0_33 = arith.constant 0 : index
      %c0_34 = arith.constant 0 : index
      %38 = vector.load %arg3[%c0_33, %c0_34] : memref<16x8xf32, #tpu.memory_space<vmem>>, vector<16x8xf32>
      %cst_35 = arith.constant dense<0.000000e+00> : vector<16x8xf32>
      %39 = tpu.matmul %37, %38, %cst_35 {dimension_numbers = #tpu.dot_dimension_numbers<[1], [0], [0], [1], [0, 0, 1, 1], [], []>} : vector<16x16xf32>, vector<16x8xf32>, vector<16x8xf32> -> vector<16x8xf32>
      %c0_36 = arith.constant 0 : index
      %c0_37 = arith.constant 0 : index
      %40 = vector.load %arg2[%c0_36, %c0_37] : memref<8x16xf32, #tpu.memory_space<vmem>>, vector<8x16xf32>
      %cst_38 = arith.constant dense<0.000000e+00> : vector<8x8xf32>
      %41 = tpu.matmul %40, %39, %cst_38 {dimension_numbers = #tpu.dot_dimension_numbers<[1], [0], [0], [1], [0, 0, 1, 1], [], []>} : vector<8x16xf32>, vector<16x8xf32>, vector<8x8xf32> -> vector<8x8xf32>
      %c0_39 = arith.constant 0 : index
      %c0_40 = arith.constant 0 : index
      %c0_41 = arith.constant 0 : index
      %42 = vector.load %arg4[%c0_39, %c0_40, %c0_41] : memref<3x8x8xf32, #tpu.memory_space<vmem>>, vector<1x8x8xf32>
      %43 = vector.shape_cast %42 : vector<1x8x8xf32> to vector<8x8xf32>
      %44 = arith.addf %41, %43 : vector<8x8xf32>
      %cst_42 = arith.constant 0.000000e+00 : f32
      %cst_43 = arith.constant 2.550000e+02 : f32
      %45 = vector.broadcast %cst_42 : f32 to vector<8x8xf32>
      %46 = arith.maximumf %45, %44 : vector<8x8xf32>
      %47 = vector.broadcast %cst_43 : f32 to vector<8x8xf32>
      %48 = arith.minimumf %47, %46 : vector<8x8xf32>
      %c0_44 = arith.constant 0 : index
      %c0_45 = arith.constant 0 : index
      %49 = vector.load %arg6[%c0_44, %c0_45] : memref<8x16xf32, #tpu.memory_space<vmem>>, vector<8x16xf32>
      %cst_46 = arith.constant dense<0.000000e+00> : vector<8x16xf32>
      %50 = tpu.matmul %48, %49, %cst_46 {dimension_numbers = #tpu.dot_dimension_numbers<[1], [0], [0], [1], [0, 0, 1, 1], [], []>} : vector<8x8xf32>, vector<8x16xf32>, vector<8x16xf32> -> vector<8x16xf32>
      %c0_47 = arith.constant 0 : index
      %c0_48 = arith.constant 0 : index
      %c0_49 = arith.constant 0 : index
      %51 = vector.load %arg8[%c0_47, %c0_48, %c0_49] : memref<3x8x16xf32, #tpu.memory_space<vmem>>, vector<1x8x16xf32>
      %52 = vector.shape_cast %51 : vector<1x8x16xf32> to vector<8x16xf32>
      %53 = vector.shape_cast %50 : vector<8x16xf32> to vector<1x8x16xf32>
      tpu.vector_store %arg8[%c0_47, %c0_48, %c0_49], %53 {strides = array<i32>} : memref<3x8x16xf32, #tpu.memory_space<vmem>>, vector<1x8x16xf32>,
      %c1_50 = arith.constant 1 : index
      %c0_51 = arith.constant 0 : index
      %c0_52 = arith.constant 0 : index
      %54 = vector.load %arg1[%c1_50, %c0_51, %c0_52] : memref<3x16x16xf32, #tpu.memory_space<vmem>>, vector<1x16x16xf32>
      %55 = vector.shape_cast %54 : vector<1x16x16xf32> to vector<16x16xf32>
      %c0_53 = arith.constant 0 : index
      %c0_54 = arith.constant 0 : index
      %56 = vector.load %arg3[%c0_53, %c0_54] : memref<16x8xf32, #tpu.memory_space<vmem>>, vector<16x8xf32>
      %cst_55 = arith.constant dense<0.000000e+00> : vector<16x8xf32>
      %57 = tpu.matmul %55, %56, %cst_55 {dimension_numbers = #tpu.dot_dimension_numbers<[1], [0], [0], [1], [0, 0, 1, 1], [], []>} : vector<16x16xf32>, vector<16x8xf32>, vector<16x8xf32> -> vector<16x8xf32>
      %c0_56 = arith.constant 0 : index
      %c0_57 = arith.constant 0 : index
      %58 = vector.load %arg2[%c0_56, %c0_57] : memref<8x16xf32, #tpu.memory_space<vmem>>, vector<8x16xf32>
      %cst_58 = arith.constant dense<0.000000e+00> : vector<8x8xf32>
      %59 = tpu.matmul %58, %57, %cst_58 {dimension_numbers = #tpu.dot_dimension_numbers<[1], [0], [0], [1], [0, 0, 1, 1], [], []>} : vector<8x16xf32>, vector<16x8xf32>, vector<8x8xf32> -> vector<8x8xf32>
      %c1_59 = arith.constant 1 : index
      %c0_60 = arith.constant 0 : index
      %c0_61 = arith.constant 0 : index
      %60 = vector.load %arg4[%c1_59, %c0_60, %c0_61] : memref<3x8x8xf32, #tpu.memory_space<vmem>>, vector<1x8x8xf32>
      %61 = vector.shape_cast %60 : vector<1x8x8xf32> to vector<8x8xf32>
      %62 = arith.addf %59, %61 : vector<8x8xf32>
      %cst_62 = arith.constant 0.000000e+00 : f32
      %cst_63 = arith.constant 2.550000e+02 : f32
      %63 = vector.broadcast %cst_62 : f32 to vector<8x8xf32>
      %64 = arith.maximumf %63, %62 : vector<8x8xf32>
      %65 = vector.broadcast %cst_63 : f32 to vector<8x8xf32>
      %66 = arith.minimumf %65, %64 : vector<8x8xf32>
      %c0_64 = arith.constant 0 : index
      %c0_65 = arith.constant 0 : index
      %67 = vector.load %arg6[%c0_64, %c0_65] : memref<8x16xf32, #tpu.memory_space<vmem>>, vector<8x16xf32>
      %cst_66 = arith.constant dense<0.000000e+00> : vector<8x16xf32>
      %68 = tpu.matmul %66, %67, %cst_66 {dimension_numbers = #tpu.dot_dimension_numbers<[1], [0], [0], [1], [0, 0, 1, 1], [], []>} : vector<8x8xf32>, vector<8x16xf32>, vector<8x16xf32> -> vector<8x16xf32>
      %c1_67 = arith.constant 1 : index
      %c0_68 = arith.constant 0 : index
      %c0_69 = arith.constant 0 : index
      %69 = vector.load %arg8[%c1_67, %c0_68, %c0_69] : memref<3x8x16xf32, #tpu.memory_space<vmem>>, vector<1x8x16xf32>
      %70 = vector.shape_cast %69 : vector<1x8x16xf32> to vector<8x16xf32>
      %71 = vector.shape_cast %68 : vector<8x16xf32> to vector<1x8x16xf32>
      tpu.vector_store %arg8[%c1_67, %c0_68, %c0_69], %71 {strides = array<i32>} : memref<3x8x16xf32, #tpu.memory_space<vmem>>, vector<1x8x16xf32>,
      %c2_70 = arith.constant 2 : index
      %c0_71 = arith.constant 0 : index
      %c0_72 = arith.constant 0 : index
      %72 = vector.load %arg1[%c2_70, %c0_71, %c0_72] : memref<3x16x16xf32, #tpu.memory_space<vmem>>, vector<1x16x16xf32>
      %73 = vector.shape_cast %72 : vector<1x16x16xf32> to vector<16x16xf32>
      %c0_73 = arith.constant 0 : index
      %c0_74 = arith.constant 0 : index
      %74 = vector.load %arg3[%c0_73, %c0_74] : memref<16x8xf32, #tpu.memory_space<vmem>>, vector<16x8xf32>
      %cst_75 = arith.constant dense<0.000000e+00> : vector<16x8xf32>
      %75 = tpu.matmul %73, %74, %cst_75 {dimension_numbers = #tpu.dot_dimension_numbers<[1], [0], [0], [1], [0, 0, 1, 1], [], []>} : vector<16x16xf32>, vector<16x8xf32>, vector<16x8xf32> -> vector<16x8xf32>
      %c0_76 = arith.constant 0 : index
      %c0_77 = arith.constant 0 : index
      %76 = vector.load %arg2[%c0_76, %c0_77] : memref<8x16xf32, #tpu.memory_space<vmem>>, vector<8x16xf32>
      %cst_78 = arith.constant dense<0.000000e+00> : vector<8x8xf32>
      %77 = tpu.matmul %76, %75, %cst_78 {dimension_numbers = #tpu.dot_dimension_numbers<[1], [0], [0], [1], [0, 0, 1, 1], [], []>} : vector<8x16xf32>, vector<16x8xf32>, vector<8x8xf32> -> vector<8x8xf32>
      %c2_79 = arith.constant 2 : index
      %c0_80 = arith.constant 0 : index
      %c0_81 = arith.constant 0 : index
      %78 = vector.load %arg4[%c2_79, %c0_80, %c0_81] : memref<3x8x8xf32, #tpu.memory_space<vmem>>, vector<1x8x8xf32>
      %79 = vector.shape_cast %78 : vector<1x8x8xf32> to vector<8x8xf32>
      %80 = arith.addf %77, %79 : vector<8x8xf32>
      %cst_82 = arith.constant 0.000000e+00 : f32
      %cst_83 = arith.constant 2.550000e+02 : f32
      %81 = vector.broadcast %cst_82 : f32 to vector<8x8xf32>
      %82 = arith.maximumf %81, %80 : vector<8x8xf32>
      %83 = vector.broadcast %cst_83 : f32 to vector<8x8xf32>
      %84 = arith.minimumf %83, %82 : vector<8x8xf32>
      %c0_84 = arith.constant 0 : index
      %c0_85 = arith.constant 0 : index
      %85 = vector.load %arg6[%c0_84, %c0_85] : memref<8x16xf32, #tpu.memory_space<vmem>>, vector<8x16xf32>
      %cst_86 = arith.constant dense<0.000000e+00> : vector<8x16xf32>
      %86 = tpu.matmul %84, %85, %cst_86 {dimension_numbers = #tpu.dot_dimension_numbers<[1], [0], [0], [1], [0, 0, 1, 1], [], []>} : vector<8x8xf32>, vector<8x16xf32>, vector<8x16xf32> -> vector<8x16xf32>
      %c2_87 = arith.constant 2 : index
      %c0_88 = arith.constant 0 : index
      %c0_89 = arith.constant 0 : index
      %87 = vector.load %arg8[%c2_87, %c0_88, %c0_89] : memref<3x8x16xf32, #tpu.memory_space<vmem>>, vector<1x8x16xf32>
      %88 = vector.shape_cast %87 : vector<1x8x16xf32> to vector<8x16xf32>
      %89 = vector.shape_cast %86 : vector<8x16xf32> to vector<1x8x16xf32>
      tpu.vector_store %arg8[%c2_87, %c0_88, %c0_89], %89 {strides = array<i32>} : memref<3x8x16xf32, #tpu.memory_space<vmem>>, vector<1x8x16xf32>,
    } else {
    }
    %c0 = arith.constant 0 : index
    %c0_1 = arith.constant 0 : index
    %3 = vector.load %arg5[%c0, %c0_1] : memref<8x8xf32, #tpu.memory_space<vmem>>, vector<8x8xf32>
    %c0_2 = arith.constant 0 : index
    %c0_3 = arith.constant 0 : index
    %c0_4 = arith.constant 0 : index
    %4 = vector.load %arg8[%c0_2, %c0_3, %c0_4] : memref<3x8x16xf32, #tpu.memory_space<vmem>>, vector<1x8x16xf32>
    %5 = vector.shape_cast %4 : vector<1x8x16xf32> to vector<8x16xf32>
    %cst = arith.constant dense<0.000000e+00> : vector<8x16xf32>
    %6 = tpu.matmul %3, %5, %cst {dimension_numbers = #tpu.dot_dimension_numbers<[1], [0], [0], [1], [0, 0, 1, 1], [], []>} : vector<8x8xf32>, vector<8x16xf32>, vector<8x16xf32> -> vector<8x16xf32>
    %cst_5 = arith.constant 0.000000e+00 : f32
    %cst_6 = arith.constant 1.000000e+00 : f32
    %7 = vector.broadcast %cst_5 : f32 to vector<8x16xf32>
    %8 = arith.maximumf %7, %6 : vector<8x16xf32>
    %9 = vector.broadcast %cst_6 : f32 to vector<8x16xf32>
    %10 = arith.minimumf %9, %8 : vector<8x16xf32>
    %c0_7 = arith.constant 0 : index
    %c0_8 = arith.constant 0 : index
    %c0_9 = arith.constant 0 : index
    %11 = vector.load %arg7[%c0_7, %c0_8, %c0_9] : memref<3x8x16xf32, #tpu.memory_space<vmem>>, vector<1x8x16xf32>
    %12 = vector.shape_cast %11 : vector<1x8x16xf32> to vector<8x16xf32>
    %13 = vector.shape_cast %10 : vector<8x16xf32> to vector<1x8x16xf32>
    tpu.vector_store %arg7[%c0_7, %c0_8, %c0_9], %13 {strides = array<i32>} : memref<3x8x16xf32, #tpu.memory_space<vmem>>, vector<1x8x16xf32>,
    %c0_10 = arith.constant 0 : index
    %c0_11 = arith.constant 0 : index
    %14 = vector.load %arg5[%c0_10, %c0_11] : memref<8x8xf32, #tpu.memory_space<vmem>>, vector<8x8xf32>
    %c1 = arith.constant 1 : index
    %c0_12 = arith.constant 0 : index
    %c0_13 = arith.constant 0 : index
    %15 = vector.load %arg8[%c1, %c0_12, %c0_13] : memref<3x8x16xf32, #tpu.memory_space<vmem>>, vector<1x8x16xf32>
    %16 = vector.shape_cast %15 : vector<1x8x16xf32> to vector<8x16xf32>
    %cst_14 = arith.constant dense<0.000000e+00> : vector<8x16xf32>
    %17 = tpu.matmul %14, %16, %cst_14 {dimension_numbers = #tpu.dot_dimension_numbers<[1], [0], [0], [1], [0, 0, 1, 1], [], []>} : vector<8x8xf32>, vector<8x16xf32>, vector<8x16xf32> -> vector<8x16xf32>
    %cst_15 = arith.constant 0.000000e+00 : f32
    %cst_16 = arith.constant 1.000000e+00 : f32
    %18 = vector.broadcast %cst_15 : f32 to vector<8x16xf32>
    %19 = arith.maximumf %18, %17 : vector<8x16xf32>
    %20 = vector.broadcast %cst_16 : f32 to vector<8x16xf32>
    %21 = arith.minimumf %20, %19 : vector<8x16xf32>
    %c1_17 = arith.constant 1 : index
    %c0_18 = arith.constant 0 : index
    %c0_19 = arith.constant 0 : index
    %22 = vector.load %arg7[%c1_17, %c0_18, %c0_19] : memref<3x8x16xf32, #tpu.memory_space<vmem>>, vector<1x8x16xf32>
    %23 = vector.shape_cast %22 : vector<1x8x16xf32> to vector<8x16xf32>
    %24 = vector.shape_cast %21 : vector<8x16xf32> to vector<1x8x16xf32>
    tpu.vector_store %arg7[%c1_17, %c0_18, %c0_19], %24 {strides = array<i32>} : memref<3x8x16xf32, #tpu.memory_space<vmem>>, vector<1x8x16xf32>,
    %c0_20 = arith.constant 0 : index
    %c0_21 = arith.constant 0 : index
    %25 = vector.load %arg5[%c0_20, %c0_21] : memref<8x8xf32, #tpu.memory_space<vmem>>, vector<8x8xf32>
    %c2 = arith.constant 2 : index
    %c0_22 = arith.constant 0 : index
    %c0_23 = arith.constant 0 : index
    %26 = vector.load %arg8[%c2, %c0_22, %c0_23] : memref<3x8x16xf32, #tpu.memory_space<vmem>>, vector<1x8x16xf32>
    %27 = vector.shape_cast %26 : vector<1x8x16xf32> to vector<8x16xf32>
    %cst_24 = arith.constant dense<0.000000e+00> : vector<8x16xf32>
    %28 = tpu.matmul %25, %27, %cst_24 {dimension_numbers = #tpu.dot_dimension_numbers<[1], [0], [0], [1], [0, 0, 1, 1], [], []>} : vector<8x8xf32>, vector<8x16xf32>, vector<8x16xf32> -> vector<8x16xf32>
    %cst_25 = arith.constant 0.000000e+00 : f32
    %cst_26 = arith.constant 1.000000e+00 : f32
    %29 = vector.broadcast %cst_25 : f32 to vector<8x16xf32>
    %30 = arith.maximumf %29, %28 : vector<8x16xf32>
    %31 = vector.broadcast %cst_26 : f32 to vector<8x16xf32>
    %32 = arith.minimumf %31, %30 : vector<8x16xf32>
    %c2_27 = arith.constant 2 : index
    %c0_28 = arith.constant 0 : index
    %c0_29 = arith.constant 0 : index
    %33 = vector.load %arg7[%c2_27, %c0_28, %c0_29] : memref<3x8x16xf32, #tpu.memory_space<vmem>>, vector<1x8x16xf32>
    %34 = vector.shape_cast %33 : vector<1x8x16xf32> to vector<8x16xf32>
    %35 = vector.shape_cast %32 : vector<8x16xf32> to vector<1x8x16xf32>
    tpu.vector_store %arg7[%c2_27, %c0_28, %c0_29], %35 {strides = array<i32>} : memref<3x8x16xf32, #tpu.memory_space<vmem>>, vector<1x8x16xf32>,
    return
  }
  func.func @transform_0(%arg0: i32) -> (i32, i32, i32) {
    %c0_i32 = arith.constant 0 : i32
    %c0_i32_0 = arith.constant 0 : i32
    %c0_i32_1 = arith.constant 0 : i32
    %c0_i32_2 = arith.constant 0 : i32
    return %c0_i32, %c0_i32_0, %c0_i32_1 : i32, i32, i32
  }
  func.func @transform_1(%arg0: i32) -> (i32, i32) {
    %c0_i32 = arith.constant 0 : i32
    %c0_i32_0 = arith.constant 0 : i32
    %c0_i32_1 = arith.constant 0 : i32
    return %c0_i32, %c0_i32_0 : i32, i32
  }
  func.func @transform_2(%arg0: i32) -> (i32, i32) {
    %c0_i32 = arith.constant 0 : i32
    %c0_i32_0 = arith.constant 0 : i32
    %c0_i32_1 = arith.constant 0 : i32
    return %c0_i32, %c0_i32_0 : i32, i32
  }
  func.func @transform_3(%arg0: i32) -> (i32, i32, i32) {
    %c0_i32 = arith.constant 0 : i32
    %c0_i32_0 = arith.constant 0 : i32
    %c0_i32_1 = arith.constant 0 : i32
    %c0_i32_2 = arith.constant 0 : i32
    return %c0_i32, %c0_i32_0, %c0_i32_1 : i32, i32, i32
  }
  func.func @transform_4(%arg0: i32) -> (i32, i32) {
    %c0_i32 = arith.constant 0 : i32
    %c0_i32_0 = arith.constant 0 : i32
    return %arg0, %c0_i32 : i32, i32
  }
  func.func @transform_5(%arg0: i32) -> (i32, i32) {
    %c0_i32 = arith.constant 0 : i32
    %c0_i32_0 = arith.constant 0 : i32
    %c0_i32_1 = arith.constant 0 : i32
    return %c0_i32, %c0_i32_0 : i32, i32
  }
  func.func @transform_6(%arg0: i32) -> (i32, i32, i32) {
    %c0_i32 = arith.constant 0 : i32
    %c0_i32_0 = arith.constant 0 : i32
    %c0_i32_1 = arith.constant 0 : i32
    return %c0_i32, %arg0, %c0_i32_0 : i32, i32, i32
  }
}

</mosaic_0001>

<bundles_post_ra>
// kernel: tpu_custom_call.1
= control target key start
LH: loop header
LB: loop body
LE: loop exit
PB: predicated region body
PF: predicated region fallthrough
CT: control target
= control target key end

     0   :  { %11 = vsyncpa [#allocation4], 0  ;;  %s1941_s0 = inlined_call_operand.vmem [shape: f32[3,16,16], index: 0, kind: input, shape index: {}]   ;;  %s1942_s1 = inlined_call_operand.hbm [shape: f32[8,16], index: 1, kind: input, shape index: {}]   ;;  %s1943_s2 = inlined_call_operand.vmem [shape: f32[16,8], index: 2, kind: input, shape index: {}]   ;;  %s1944_s3 = inlined_call_operand.hbm [shape: f32[3,8,8], index: 3, kind: input, shape index: {}]   ;;  %s1945_s4 = inlined_call_operand.vmem [shape: f32[16,8], index: 4, kind: input, shape index: {}]   ;;  %s1946_s5 = inlined_call_operand.vmem [shape: f32[8,16], index: 5, kind: input, shape index: {}]   ;;  %s1947_s6 = inlined_call_operand.hbm [shape: f32[3,16,16], index: 6, kind: output, shape index: {}]  }
   0x1   :  { %12 = vsyncpa [#allocation7], 0 }
   0x2   :  { %13 = vsyncpa [#allocation5], 0 }
   0x3   :  { %15 = vsyncpa [#allocation5 + $0x1], 0  ;;  %s1713_s21 = smov 0   ;;  %s1715_s22 = smov 0  }
   0x4   :  { %s1717_s23 = smov 0   ;;  %s1719_s24 = smov 0  }
   0x5 LB: > { %s1734_s25 = sadd.s32 4294967295, %s1664_s24   ;;  %s1335_s26 = sadd.s32 4294967294, %s1664_s24   ;;  %s1664_s24 = sphi %s1719_s24, %s1966_s24   ;;  %s1660_s23 = sphi %s1717_s23, %s1965_s23   ;;  %s1656_s22 = sphi %s1715_s22, %s1964_s22   ;;  %s1652_s21 = sphi %s1713_s21, %s1963_s21  }
   0x6   : > { %s1738_s27 = sadd.s32 1, %s1664_s24   ;;  %s159_s28 = sadd.s32 1, %s1660_s23 }
   0x7   : > { %s156_s29 = ssub.s32 %s1664_s24, %s1738_s27  ;;  %p169_p0 = scmp.ne.s32.totalorder %s1660_s23, %s1656_s22 }
   0x8   : > { %p157_p1 = scmp.eq.s32.totalorder %s156_s29, 0  ;;  %p170_p2 = scmp.eq.s32.totalorder %s1734_s25, 1 }
   0x9   : > { %p175_p3 = scmp.ne.s32.totalorder %s1656_s22, %s1652_s21  ;;  %p176_p4 = scmp.eq.s32.totalorder %s1335_s26, 1 }
   0xa   : > { %s1749_s30 = scalar_select %p157_p1, %s1660_s23, %s159_s28  }
   0xb   : > { %p1751_p5 = por %p170_p2, %p169_p0  ;;  %p1755_p6 = por %p176_p4, %p175_p3 }
   0xc   : > { %p1336_p7 = scmp.ge.s32.totalorder %s1664_s24, 1  ;;  %p183_p8 = scmp.lt.s32.totalorder %s1664_s24, 3 }
   0xd   : > { %s1951_s7 = scalar_select %p1751_p5, 1, 0 }
   0xe   : > { %s1952_s8 = scalar_select %p1755_p6, 1, 0 }
   0xf   : > { %p1948_p10 = scmp.eq.s32.totalorder %s1734_s25, 0  ;;  %p1763_p11 = pnand %p1336_p7, %p183_p8 }
  0x10   : > { %s1666_s10 = smov [#allocation3]   ;;  %s1667_s12 = smov [#allocation6]  }
  0x11   : > { %s1953_s9 = scalar_select %p1763_p11, 1, 0 }
  0x12   : > { %s199_s11 = sshll.u32 %s1666_s10, 4  ;;  %p1485_p12 = pneg %p1763_p11  ;;  %s200_s11 = int_to_ptr.vmem [resolvable:$true] %s199_s11 }
  0x13   : > { %s212_s13 = sshll.u32 %s1667_s12, 4  ;;  %s1555_s15 = scalar_lea.vmem %s200_s11, 128  ;;  %s213_s13 = int_to_ptr.vmem [resolvable:$true] %s212_s13 }
  0x14   : > { %p1771_p13 = pnand %p1948_p10, %p1485_p12  ;;  %p1556_p1 = scmp.ne.s32.totalorder %s200_s11, %s1555_s15 }
  0x15   : > { %p1563_p4 = scmp.lt.s32.totalorder %s200_s11, %s200_s11  ;;  %p1564_p7 = scmp.lt.s32.totalorder %s1555_s15, %s1555_s15 }
  0x16   : > { %p1546_p0 = pneg %p1771_p13 }
  0x17   : > { %p1565_p8 = por %p1564_p7, %p1563_p4 }
  0x18   : > { %p1558_p2 = pnand %p1556_p1, %p1546_p0 }
  0x1a   : > { %p1559_p3 = pneg %p1558_p2 }
  0x1c   : > { %p1566_p9 = pnand %p1565_p8, %p1559_p3 }
  0x1e   : > { %1569 = shalt.err (!%p1566_p9)
}
  0x1f   : > { %1488 = dma.hbm_to_vmem [thread:$0]  (!%p1771_p13), %s1942_s1, 128, %s200_s11, [#allocation4]  }
  0x20   : > { %s1581_s18 = scalar_lea.vmem %s213_s13, 384  ;;  %p1589_p1 = scmp.lt.s32.totalorder %s213_s13, %s213_s13 }
  0x21   : > { %p1582_p12 = scmp.ne.s32.totalorder %s213_s13, %s1581_s18  ;;  %p1590_p2 = scmp.lt.s32.totalorder %s1581_s18, %s1581_s18 }
  0x23   : > { %p1584_p10 = pnand %p1582_p12, %p1546_p0  ;;  %p1591_p5 = por %p1590_p2, %p1589_p1 }
  0x25   : > { %p1585_p6 = pneg %p1584_p10 }
  0x27   : > { %p1592_p11 = pnand %p1591_p5, %p1585_p6 }
  0x29   : > { %1595 = shalt.err (!%p1592_p11)
}
  0x2a   : > { %s1668_s19 = smov 128   ;;  %s1669_s20 = smov 8  }
  0x2b   : > { %1491 = dma.hbm_to_vmem [thread:$0]  (!%p1771_p13), %s1944_s3, 384, %s213_s13, [#allocation7], %s1668_s19, %s1668_s19, %s1669_s20  }
  0x2c   : > { %p1955_p9 = scmp.ne.s32.totalorder %s1953_s9, 0 }
  0x2d   : > { %p1956_p3 = scmp.eq.s32.totalorder (!%p1955_p9), %s1734_s25, 0 }
  0x2e   : > { %238 = sbr.rel (%p1955_p9) target bundleno = 1283 (0x503), region = 44 }
  0x33   : > { %1639 = dma.done.wait (%p1956_p3), [#allocation4], 128   ;;  %p1957_p10 = pmov %p1956_p3 }
  0x34   : > { %p1958_p5 = pmov %p1956_p3 }
  0x35   : > { %1641 = vsyncadd (%p1957_p10), [#allocation4], 4294967168 }
  0x36   : > { %1643 = dma.done.wait (%p1958_p5), [#allocation7], 384   ;;  %p1959_p6 = pmov %p1956_p3 }
  0x37   : > { %s268_s29 = sand.u32 1, %s1656_s22   ;;  %p271_p11 = scmp.lt.s32.totalorder %s1734_s25, 1 }
  0x38   : > { %1645 = vsyncadd (%p1959_p6), [#allocation7], 4294966912  ;;  %s1474_s9 = smul.u32 24, %s268_s29  ;;  %p1960_p13 = scmp.ne.s32.totalorder %s1734_s25, 0 }
  0x39   : > { %s272_s10 = scalar_select %p271_p11, %s1734_s25, 1 }
  0x3a   : > { %s1813_s15 = scalar_lea.vmem [#allocation8], %s1474_s9  ;;  %278 = sbr.rel (%p1960_p13) target bundleno = 1064 (0x428), region = 56 }
  0x3b   : > { %s1343_s11 = sshll.u32 %s272_s10, 3 }
  0x3c   : > { %s1811_s14 = scalar_lea.vmem %s1945_s4, %s1343_s11 }
  0x3f   : > { %v282_v0 = vld [vmem:[%s1943_s2 + $0x8] sm:$0xff]  ;;  %v281_v1 = vld [vmem:[%s1943_s2] sm:$0xff]  ;;  %vm283_vm0 = vcmask 130048   ;;  %v1670_v4 = vmov 0.0   ;;  %vm1671_vm1 = vmmov 0   ;;  %v365_v6 = vld [vmem:[#allocation3] sm:$0xff] }
  0x40   : > { %v279_v2 = vld [vmem:[%s1941_s0] sm:$0xff]  ;;  %1402 = vmatprep.subr.mxu0 %v282_v0  ;;  %v280_v3 = vld [vmem:[%s1941_s0 + $0x8] sm:$0xff]  ;;  %1409 = vmatprep.subr.mxu1 %v1670_v4  ;;  %v1349_v8 = vld [vmem:[%s1941_s0 + $0x10] sm:$0xff]  ;;  %vm443_vm2 = vcmask 64512  }
  0x41   : > { %1406 = vmatprep.mubr.msk.f32.mxu0 %vm283_vm0, %v279_v2  ;;  %1403 = vmatpush3.msra.mxu0 %v282_v0  ;;  %v1350_v9 = vld [vmem:[%s1941_s0 + $0x18] sm:$0xff]  ;;  %v442_v10 = vld [vmem:[%s1946_s5] sm:$0xff]  ;;  %v1356_v20 = vld [vmem:[%s1941_s0 + $0x28] sm:$0xff] }
  0x42   : > { %1404 = vmatprep.subr.mxu0 %v281_v1  ;;  %1413 = vmatprep.mubr.msk.f32.mxu1 %vm1671_vm1, %v1670_v4  ;;  %v366_v11 = vld [vmem:[#allocation6] sm:$0xff]  ;;  %v606_v23 = vld [vmem:[#allocation6 + $0x8] sm:$0xff]  ;;  %v846_v33 = vld [vmem:[#allocation6 + $0x10] sm:$0xff] }
  0x43   : > { %1405 = vmatpush3.msra.mxu0 %v281_v1  ;;  %v1355_v19 = vld [vmem:[%s1941_s0 + $0x20] sm:$0xff] }
  0x44   : > { %1407 = vmatmul.mubr.msk.f32.vlgmr.msra.gmra.mxu0 %vm283_vm0, %v280_v3  ;;  %1416 = vmatprep.subr.mxu0 %v1670_v4 }
  0x45   : > { %1418 = vmatprep.mubr.msk.f32.mxu0 %vm1671_vm1, %v1670_v4  ;;  %1417 = vmatpush3.msra.mxu0 %v442_v10 }
  0x46   : > { %1428 = vmatprep.subr.mxu0 %v1670_v4 }
 0x104   : > { %v1408_v5 = vpop.f32.mrf.mxu0 }
 0x105   : > { %1410 = vmatpush3.msra.mxu1 %v1408_v5 }
 0x106   : > { %v356_v7 = vpop.f32.mrf.mxu0  ;;  %1411 = vmatprep.subr.mxu1 %v1670_v4 }
 0x107   : > { %1412 = vmatpush3.msra.mxu1 %v356_v7 }
 0x108   : > { %1414 = vmatmul.mubr.msk.f32.vlgmr.msra.gmra.mxu1 %vm283_vm0, %v365_v6  ;;  %1421 = vmatprep.subr.mxu1 %v282_v0 }
 0x109   : > { %1422 = vmatpush3.msra.mxu1 %v282_v0  ;;  %1425 = vmatprep.mubr.msk.f32.mxu1 %vm283_vm0, %v1349_v8 }
 0x10a   : > { %1423 = vmatprep.subr.mxu1 %v281_v1 }
 0x10b   : > { %1424 = vmatpush3.msra.mxu1 %v281_v1 }
 0x10c   : > { %1426 = vmatmul.mubr.msk.f32.vlgmr.msra.gmra.mxu1 %vm283_vm0, %v1350_v9  ;;  %1435 = vmatprep.subr.mxu1 %v1670_v4 }
 0x10d   : > { %1437 = vmatprep.mubr.msk.f32.mxu1 %vm1671_vm1, %v1670_v4  ;;  %1436 = vmatpush3.msra.mxu1 %v442_v10 }
 0x10e   : > { %1447 = vmatprep.subr.mxu1 %v1670_v4 }
 0x1c8   : > { %v436_v12 = vpop.f32.mrf.mxu1 }
 0x1c9   : > { %v437_v13 = vadd.f32 %v436_v12, %v366_v11 }
 0x1ca   : > { %v1415_v14 = vpop.f32.mrf.mxu1 }
 0x1cb   : > { %v440_v15 = vmax.f32 %v437_v13, 0.0 }
 0x1cc   : > { %v1427_v16 = vpop.f32.mrf.mxu1 }
 0x1cd   : > { %v441_v17 = vmin.f32 %v440_v15, 255.0 }
 0x1ce   : > { %v595_v18 = vpop.f32.mrf.mxu1 }
 0x1cf   : > { %1419 = vmatmul.mubr.msk.f32.vlgmr.msra.gmra.mxu0 %vm443_vm2, %v441_v17 }
 0x1d0   : > { %1429 = vmatpush3.msra.mxu0 %v1427_v16  ;;  %1432 = vmatprep.mubr.msk.f32.mxu0 %vm1671_vm1, %v1670_v4 }
 0x1d1   : > { %1430 = vmatprep.subr.mxu0 %v1670_v4 }
 0x1d2   : > { %1431 = vmatpush3.msra.mxu0 %v595_v18 }
 0x1d3   : > { %1433 = vmatmul.mubr.msk.f32.vlgmr.msra.gmra.mxu0 %vm283_vm0, %v365_v6  ;;  %1440 = vmatprep.subr.mxu0 %v282_v0 }
 0x1d4   : > { %1441 = vmatpush3.msra.mxu0 %v282_v0  ;;  %1444 = vmatprep.mubr.msk.f32.mxu0 %vm283_vm0, %v1355_v19 }
 0x1d5   : > { %1442 = vmatprep.subr.mxu0 %v281_v1 }
 0x1d6   : > { %1443 = vmatpush3.msra.mxu0 %v281_v1 }
 0x1d7   : > { %1445 = vmatmul.mubr.msk.f32.vlgmr.msra.gmra.mxu0 %vm283_vm0, %v1356_v20  ;;  %1454 = vmatprep.subr.mxu0 %v1670_v4 }
 0x1d8   : > { %1455 = vmatpush3.msra.mxu0 %v442_v10  ;;  %1456 = vmatprep.mubr.msk.f32.mxu0 %vm1671_vm1, %v1670_v4 }
 0x28f   : > { %v513_v21 = vpop.f32.mrf.mxu0 }
 0x290   : > { %517 = vst.msk [vmem:[#allocation2] sm:$0xff] %vm283_vm0, %v513_v21 }
 0x291   : > { %v1420_v22 = vpop.f32.mrf.mxu0 }
 0x293   : > { %v676_v24 = vpop.f32.mrf.mxu0 }
 0x294   : > { %v677_v25 = vadd.f32 %v676_v24, %v606_v23 }
 0x295   : > { %v1434_v26 = vpop.f32.mrf.mxu0 }
 0x296   : > { %v680_v27 = vmax.f32 %v677_v25, 0.0 }
 0x297   : > { %v1446_v28 = vpop.f32.mrf.mxu0 }
 0x298   : > { %v681_v29 = vmin.f32 %v680_v27, 255.0 }
 0x299   : > { %v835_v30 = vpop.f32.mrf.mxu0 }
 0x29a   : > { %1438 = vmatmul.mubr.msk.f32.vlgmr.msra.gmra.mxu1 %vm443_vm2, %v681_v29 }
 0x29b   : > { %1448 = vmatpush3.msra.mxu1 %v1446_v28  ;;  %1451 = vmatprep.mubr.msk.f32.mxu1 %vm1671_vm1, %v1670_v4 }
 0x29c   : > { %1449 = vmatprep.subr.mxu1 %v1670_v4 }
 0x29d   : > { %1450 = vmatpush3.msra.mxu1 %v835_v30 }
 0x29e   : > { %1452 = vmatmul.mubr.msk.f32.vlgmr.msra.gmra.mxu1 %vm283_vm0, %v365_v6 }
 0x35a   : > { %v752_v31 = vpop.f32.mrf.mxu1 }
 0x35b   : > { %757 = vst.msk [vmem:[#allocation2 + $0x8] sm:$0xff] %vm283_vm0, %v752_v31 }
 0x35c   : > { %v1439_v32 = vpop.f32.mrf.mxu1 }
 0x35e   : > { %v916_v34 = vpop.f32.mrf.mxu1 }
 0x35f   : > { %v917_v35 = vadd.f32 %v916_v34, %v846_v33 }
 0x360   : > { %v1453_v36 = vpop.f32.mrf.mxu1 }
 0x361   : > { %v920_v37 = vmax.f32 %v917_v35, 0.0 }
 0x363   : > { %v921_v38 = vmin.f32 %v920_v37, 255.0 }
 0x365   : > { %1457 = vmatmul.mubr.msk.f32.vlgmr.msra.gmra.mxu0 %vm443_vm2, %v921_v38 }
 0x425   : > { %v992_v39 = vpop.f32.mrf.mxu0 }
 0x426   : > { %997 = vst.msk [vmem:[#allocation2 + $0x10] sm:$0xff] %vm283_vm0, %v992_v39 }
 0x427   : > { %v1458_v40 = vpop.f32.mrf.mxu0 }
 0x428 PF: > { %v999_v41 = vld [vmem:[#allocation2] sm:$0xff]  ;;  %vm1000_vm3 = vcmask 64512   ;;  %v1672_v43 = vmov 0.0   ;;  %vm1673_vm4 = vmmov 0   ;;  %v1080_v45 = vld [vmem:[#allocation2 + $0x8] sm:$0xff]  ;;  %vm1076_vm5 = vcmask 130048  }
 0x429   : > { %v998_v42 = vld [vmem:[%s1811_s14] sm:$0xff]  ;;  %1459 = vmatprep.subr.mxu0 %v1672_v43  ;;  %1461 = vmatprep.mubr.msk.f32.mxu0 %vm1673_vm4, %v1672_v43  ;;  %s1366_s14 = sshll.u32 %s1734_s25, 7  ;;  %s1251_s28 = sshll.u32 %s1813_s15, 4  ;;  %s1893_s28 = int_to_ptr.vmem [resolvable:$true] %s1251_s28 }
 0x42a   : > { %1460 = vmatpush3.msra.mxu0 %v999_v41  ;;  %1464 = vmatprep.subr.mxu1 %v1672_v43  ;;  %s1891_s11 = scalar_lea.hbm %s1947_s6, %s1366_s14  ;;  %s1901_s25 = scalar_lea.sflag [#allocation5], %s268_s29 }
 0x42b   : > { %1462 = vmatmul.mubr.msk.f32.vlgmr.msra.gmra.mxu0 %vm1000_vm3, %v998_v42  ;;  %1469 = vmatprep.subr.mxu0 %v1672_v43  ;;  %s1596_s12 = scalar_lea.vmem %s1893_s28, 384  ;;  %p1961_p4 = scmp.ne.s32.totalorder %s1951_s7, 0 }
 0x42c   : > { %1465 = vmatpush3.msra.mxu1 %v1080_v45  ;;  %1466 = vmatprep.mubr.msk.f32.mxu1 %vm1673_vm4, %v1672_v43  ;;  %p1597_p0 = scmp.ne.s32.totalorder %s1893_s28, %s1596_s12  ;;  %s1674_s13 = smov [#allocation8]  }
 0x42d   : > { %v1160_v44 = vld [vmem:[#allocation2 + $0x10] sm:$0xff]  ;;  %1471 = vmatprep.mubr.msk.f32.mxu0 %vm1673_vm4, %v1672_v43  ;;  %1467 = vmatmul.mubr.msk.f32.vlgmr.msra.gmra.mxu1 %vm1000_vm3, %v998_v42  ;;  %s1600_s16 = sshll.u32 %s1674_s13, 4  ;;  %s1601_s16 = int_to_ptr.vmem [resolvable:$false] %s1600_s16 }
 0x42e   : > { %1470 = vmatpush3.msra.mxu0 %v1160_v44  ;;  %p1598_p7 = pnand %p1597_p0, %p1961_p4  ;;  %s1602_s17 = scalar_lea.vmem %s1601_s16, 768 }
 0x42f   : > { %1472 = vmatmul.mubr.msk.f32.vlgmr.msra.gmra.mxu0 %vm1000_vm3, %v998_v42  ;;  %p1603_p12 = scmp.lt.s32.totalorder %s1893_s28, %s1601_s16  ;;  %p1604_p1 = scmp.lt.s32.totalorder %s1602_s17, %s1596_s12 }
 0x430   : > { %p1599_p8 = pneg %p1598_p7 }
 0x431   : > { %p1605_p2 = por %p1604_p1, %p1603_p12 }
 0x433   : > { %p1606_p9 = pnand %p1605_p2, %p1599_p8 }
 0x4eb   : > { %v1070_v46 = vpop.f32.mrf.mxu0 }
 0x4ec   : > { %v1074_v47 = vmax.f32 %v1070_v46, 0.0 }
 0x4ed   : > { %v1463_v48 = vpop.f32.mrf.mxu0  ;;  %v1150_v50 = vpop.f32.mrf.mxu1 }
 0x4ee   : > { %v1075_v49 = vmin.f32 %v1074_v47, 1.0  ;;  %v1154_v51 = vmax.f32 %v1150_v50, 0.0 }
 0x4ef   : > { %v1230_v52 = vpop.f32.mrf.mxu0  ;;  %v1468_v54 = vpop.f32.mrf.mxu1 }
 0x4f0   : > { %1077 = vst.msk [vmem:[%s1813_s15] sm:$0xff] %vm1076_vm5, %v1075_v49  ;;  %v1234_v53 = vmax.f32 %v1230_v52, 0.0  ;;  %v1155_v55 = vmin.f32 %v1154_v51, 1.0 }
 0x4f1   : > { %v1473_v56 = vpop.f32.mrf.mxu0 }
 0x4f2   : > { %v1235_v57 = vmin.f32 %v1234_v53, 1.0  ;;  %1363 = vst.msk [vmem:[%s1813_s15 + $0x8] sm:$0xff] %vm1076_vm5, %v1155_v55 }
 0x4f4   : > { %1365 = vst.msk [vmem:[%s1813_s15 + $0x10] sm:$0xff] %vm1076_vm5, %v1235_v57 }
 0x4f5   : > { %1609 = shalt.err (!%p1606_p9)
}
 0x4f6   : > { %s1610_s29 = scalar_lea.hbm %s1891_s11, 384  ;;  %s1614_s19 = scalar_lea.hbm %s1947_s6, 768 }
 0x4f7   : > { %p1611_p3 = scmp.ne.s32.totalorder %s1891_s11, %s1610_s29  ;;  %p1615_p6 = scmp.lt.s32.totalorder %s1891_s11, %s1947_s6 }
 0x4f8   : > { %p1616_p11 = scmp.lt.s32.totalorder %s1614_s19, %s1610_s29 }
 0x4f9   : > { %p1612_p10 = pnand %p1611_p3, %p1961_p4 }
 0x4fa   : > { %p1617_p13 = por %p1616_p11, %p1615_p6 }
 0x4fb   : > { %p1613_p5 = pneg %p1612_p10 }
 0x4fd   : > { %p1618_p0 = pnand %p1617_p13, %p1613_p5 }
 0x4ff   : > { %1621 = shalt.err (!%p1618_p0)
}
 0x500   : > { %s1675_s14 = smov 128   ;;  %s1676_s9 = smov 256  }
 0x501   : > { %s1677_s10 = smov 8  }
 0x502   : > { %1483 = dma.vmem_to_hbm [thread:$0]  (%p1961_p4), %s1893_s28, 384, %s1891_s11, %s1901_s25, %s1675_s14, %s1676_s9, %s1677_s10  }
 0x503 PF: > { %p1500_p7 = scmp.ge.s32.totalorder %s1664_s24, 2  ;;  %s1266_s12 = sand.u32 1, %s1652_s21  }
 0x504   : > { %p1962_p8 = scmp.ne.s32.totalorder %s1952_s8, 0  ;;  %s1267_s13 = scalar_lea.sflag [#allocation5], %s1266_s12 }
 0x506   : > { %p1493_p12 = pnand %p1500_p7, %p1962_p8 }
 0x508   : > { %p1494_p1 = pneg %p1493_p12 }
 0x50a   : > { %1647 = dma.done.wait (%p1494_p1), %s1267_s13, 384  }
 0x50b   : > { %1649 = vsyncadd (%p1494_p1), %s1267_s13, 4294966912  ;;  %p18_p2 = scmp.ge.s32.totalorder %s1738_s27, 4   ;;  %s1963_s21 = smov %s1656_s22 }
 0x50c   : > { %s1964_s22 = smov %s1660_s23  ;;  %s1965_s23 = smov %s1749_s30 }
 0x50d   : > { %s1966_s24 = smov %s1738_s27  ;;  %20 = sbr.rel (!%p18_p2) target bundleno = 5 (0x5), region = 102 }
 0x512   :  { %1272 = vsyncpa [#allocation4], 1 }
 0x513   :  { %1274 = vsyncpa [#allocation4 + $0x1], 1 }
 0x514   :  { %1275 = vsyncpa [#allocation7], 1 }
 0x515   :  { %1276 = vsyncpa [#allocation5], 1 }
 0x516   :  { %1278 = vsyncpa [#allocation5 + $0x1], 1 }

</bundles_post_ra>
